<compile_context>
chip_gen: v5e
topology: v5e:2x2
jax: 0.10.0
libtpu: 0.0.40
codegen_flags: <defaults>
</compile_context>

<pallas_src>
import functools

import jax
import jax.numpy as jnp
from jax import lax
from jax.experimental import pallas as pl
from jax.experimental.pallas import tpu as pltpu

SCALE = 16.0
MARGIN = 0.1


def _round_up(v, m):
    return ((v + m - 1) // m) * m


def _scaled_lse_kernel(x_ref, out_ref, m_ref, l_ref, *,
                       scale, tile_c, num_classes, mask_last_tile):
    """One (batch-tile, class-tile) grid step of a per-row logsumexp(s * x).

    x_ref:   (TB, TC) f32/bf16 logits tile
    out_ref: (TB, 1)  f32 per-row logsumexp (written at the last class tile)
    m_ref/l_ref: (TB, 1) f32 VMEM scratch (running max / running exp-sum)
    """
    j = pl.program_id(1)

    # ---- init running stats at the first class tile of each batch tile ----
    @pl.when(j == 0)
    def _init():
        m_ref[...] = jnp.full(m_ref.shape, -jnp.inf, dtype=jnp.float32)
        l_ref[...] = jnp.zeros(l_ref.shape, dtype=jnp.float32)

    x = x_ref[...].astype(jnp.float32) * scale       # bf16 upcast in-VMEM, f32 math

    if mask_last_tile:
        # Only compiled when C % tile_c != 0.  Scalar limit + local iota keeps
        # the index math out of the per-element domain.
        tb, tc = x.shape
        limit = num_classes - j * tile_c             # scalar; >= tile_c on full tiles
        lane = lax.broadcasted_iota(jnp.int32, (tb, tc), 1)
        x = jnp.where(lane < limit, x, -jnp.inf)

    # ---- online logsumexp update ----
    m_prev = m_ref[...]
    m_new = jnp.maximum(m_prev, jnp.max(x, axis=-1, keepdims=True))
    l_ref[...] = (jnp.exp(m_prev - m_new) * l_ref[...]
                  + jnp.sum(jnp.exp(x - m_new), axis=-1, keepdims=True))
    m_ref[...] = m_new

    # ---- finalize ----
    @pl.when(j == pl.num_programs(1) - 1)
    def _finalize():
        out_ref[...] = (m_ref[...] + jnp.log(l_ref[...])).astype(out_ref.dtype)


def arcface_loss(inputs: jax.Array, targets: jax.Array, *,
                 scale: float = SCALE, margin: float = MARGIN,
                 tile_b: int | None = None, tile_c: int | None = None) -> jax.Array:
    """inputs: (B, C) f32/bf16 logits; targets: (B,) int labels -> scalar loss."""
    b, c = inputs.shape
    itemsize = jnp.dtype(inputs.dtype).itemsize
    # dtype-aware sublane packing multiple (f32: 8, bf16: 16, 8-bit: 32)
    sub = {4: 8, 2: 16, 1: 32}.get(itemsize, 8)

    # Defaults: ~4 MiB logits tile per buffer regardless of dtype
    # (4096 classes for f32, 8192 for bf16).
    if tile_c is None:
        tile_c = (4096 * 4) // itemsize
    if tile_b is None:
        tile_b = 256

    # Class tiling: full width when C fits, otherwise a 128-aligned tile.
    tile_c = c if tile_c >= c else _round_up(tile_c, 128)
    # Batch tiling: dtype-aware sublane rounding; guarantee >= 2 batch tiles
    # whenever B allows so the "parallel" axis shards across v7x's 2 TCs.
    tile_b = _round_up(max(1, min(tile_b, b)), sub)
    if b > sub:
        tile_b = min(tile_b, _round_up((b + 1) // 2, sub))

    grid = (pl.cdiv(b, tile_b), pl.cdiv(c, tile_c))

    # VMEM budget: double-buffered logits + headroom for f32 intermediates,
    # capped at 48 MiB so the config stays safe on v7x (64 MiB physical VMEM).
    tile_bytes = tile_b * tile_c * itemsize
    vmem_limit = int(min(48 * 1024 * 1024,
                         max(32 * 1024 * 1024,
                             2 * tile_bytes + 2 * tile_b * tile_c * 4 + (1 << 20))))

    kernel = functools.partial(
        _scaled_lse_kernel,
        scale=float(scale), tile_c=tile_c, num_classes=c,
        mask_last_tile=(c % tile_c != 0))

    lse = pl.pallas_call(
        kernel,
        out_shape=jax.ShapeDtypeStruct((b, 1), jnp.float32),
        grid_spec=pltpu.PrefetchScalarGridSpec(
            num_scalar_prefetch=0,
            grid=grid,
            in_specs=[pl.BlockSpec((tile_b, tile_c), lambda i, j: (i, j))],
            out_specs=pl.BlockSpec((tile_b, 1), lambda i, j: (i, 0)),
            scratch_shapes=[pltpu.VMEM((tile_b, 1), jnp.float32)] * 2,
        ),
        compiler_params=pltpu.CompilerParams(
            dimension_semantics=("parallel", "arbitrary"),
            vmem_limit_bytes=vmem_limit,
        ),
    )(inputs)[:, 0]                                            # (B,) logsumexp(s*x)

    # Target logit s*x_t via a tiny gather (B elements of HBM traffic); keeps
    # the kernel's hot loop free of one-hot / margin arithmetic entirely.
    t = targets.astype(jnp.int32)
    tgt = float(scale) * jnp.take_along_axis(
        inputs, t[:, None], axis=1).astype(jnp.float32)[:, 0]

    # Apply the CosFace additive margin analytically (exact rewrite of
    # logsumexp over s*(x - one_hot*m); safe since exp(tgt - lse) <= 1).
    sm = float(scale) * float(margin)
    lse_m = lse + jnp.log1p(jnp.expm1(-sm) * jnp.exp(tgt - lse))
    per_row = lse_m - (tgt - sm)

    # Mean over the *global* batch (tiny op, outside the kernel).
    return jnp.mean(per_row)


def _reference_loss(inputs, targets, scale=SCALE, margin=MARGIN):
    """Pure-JAX reference mirroring the PyTorch forward."""
    x = inputs.astype(jnp.float32)
    one_hot = jax.nn.one_hot(targets, x.shape[1], dtype=jnp.float32)
    logits = scale * (x - one_hot * margin)
    logp = jax.nn.log_softmax(logits, axis=-1)
    return -jnp.mean(jnp.sum(one_hot * logp, axis=-1))


if __name__ == "__main__":
    key = jax.random.PRNGKey(0)
    k_x, k_t = jax.random.split(key)

    # Small shapes that still exercise the grid machinery.
    B, C = 20, 300
    inputs = jax.random.normal(k_x, (B, C), dtype=jnp.float32)
    targets = jax.random.randint(k_t, (B,), 0, C, dtype=jnp.int32)
    ref = _reference_loss(inputs, targets)

    # 1) small tiles: 3x3 grid, partial last tiles on both axes, lane-mask path.
    loss_small = arcface_loss(inputs, targets, tile_b=8, tile_c=128)
    jax.block_until_ready(loss_small)
    assert jnp.allclose(loss_small, ref, rtol=1e-4, atol=1e-5), (loss_small, ref)

    # 2) default config: single full-width class tile (no mask compiled),
    #    >= 2 batch tiles with a partial last batch tile.
    loss_default = arcface_loss(inputs, targets)
    jax.block_until_ready(loss_default)
    assert jnp.allclose(loss_default, ref, rtol=1e-4, atol=1e-5), (loss_default, ref)

    # 3) bf16 inputs: halved HBM bytes, dtype-aware 16-sublane batch tiling,
    #    kernel upcasts to f32 in-VMEM.
    x_bf16 = inputs.astype(jnp.bfloat16)
    loss_bf16 = arcface_loss(x_bf16, targets)
    jax.block_until_ready(loss_bf16)
    ref_bf16 = _reference_loss(x_bf16.astype(jnp.float32), targets)
    assert jnp.allclose(loss_bf16, ref_bf16, rtol=1e-4, atol=1e-4), (loss_bf16, ref_bf16)

    print("KERNEL_OK")
</pallas_src>

<mosaic_0001>
module attributes {stable_mosaic.version = 11 : i64} {
  func.func @_scaled_lse_kernel(%arg0: i32, %arg1: i32, %arg2: memref<8x128xf32, #tpu.memory_space<vmem>>, %arg3: memref<8x1xf32, #tpu.memory_space<vmem>>, %arg4: memref<8x1xf32, #tpu.memory_space<vmem>>, %arg5: memref<8x1xf32, #tpu.memory_space<vmem>>) attributes {dimension_semantics = [#tpu.dimension_semantics<parallel>, #tpu.dimension_semantics<arbitrary>], iteration_bounds = array<i64: 3, 3>, scalar_prefetch = 0 : i64, scratch_operands = 2 : i64, tpu.core_type = #tpu.core_type<tc>, window_params = [{transform_indices = @transform_0, window_bounds = array<i64: 8, 128>}, {transform_indices = @transform_1, window_bounds = array<i64: 8, 1>}]} {
    %c0_i32 = arith.constant 0 : i32
    %0 = arith.cmpi eq, %arg1, %c0_i32 : i32
    %1 = arith.extui %0 : i1 to i32
    %c0_i32_0 = arith.constant 0 : i32
    %2 = arith.cmpi ne, %1, %c0_i32_0 : i32
    scf.if %2 {
      %cst_14 = arith.constant 0xFF800000 : f32
      %32 = vector.broadcast %cst_14 : f32 to vector<8x1xf32>
      %c0_15 = arith.constant 0 : index
      %c0_16 = arith.constant 0 : index
      %33 = vector.load %arg4[%c0_15, %c0_16] : memref<8x1xf32, #tpu.memory_space<vmem>>, vector<8x1xf32>
      tpu.vector_store %arg4[%c0_15, %c0_16], %32 {strides = array<i32>} : memref<8x1xf32, #tpu.memory_space<vmem>>, vector<8x1xf32>,
      %cst_17 = arith.constant 0.000000e+00 : f32
      %34 = vector.broadcast %cst_17 : f32 to vector<8x1xf32>
      %c0_18 = arith.constant 0 : index
      %c0_19 = arith.constant 0 : index
      %35 = vector.load %arg5[%c0_18, %c0_19] : memref<8x1xf32, #tpu.memory_space<vmem>>, vector<8x1xf32>
      tpu.vector_store %arg5[%c0_18, %c0_19], %34 {strides = array<i32>} : memref<8x1xf32, #tpu.memory_space<vmem>>, vector<8x1xf32>,
    } else {
    }
    %c0 = arith.constant 0 : index
    %c0_1 = arith.constant 0 : index
    %3 = vector.load %arg2[%c0, %c0_1] : memref<8x128xf32, #tpu.memory_space<vmem>>, vector<8x128xf32>
    %cst = arith.constant 1.600000e+01 : f32
    %4 = vector.broadcast %cst : f32 to vector<8x128xf32>
    %5 = arith.mulf %3, %4 : vector<8x128xf32>
    %c128_i32 = arith.constant 128 : i32
    %6 = arith.muli %arg1, %c128_i32 : i32
    %c300_i32 = arith.constant 300 : i32
    %7 = arith.subi %c300_i32, %6 : i32
    %8 = tpu.iota {dimensions = array<i32: 1>} : vector<8x128xi32>
    %9 = vector.broadcast %7 : i32 to vector<8x128xi32>
    %10 = arith.cmpi slt, %8, %9 : vector<8x128xi32>
    %cst_2 = arith.constant 0xFF800000 : f32
    %11 = vector.broadcast %cst_2 : f32 to vector<8x128xf32>
    %12 = arith.select %10, %5, %11 : vector<8x128xi1>, vector<8x128xf32>
    %c0_3 = arith.constant 0 : index
    %c0_4 = arith.constant 0 : index
    %13 = vector.load %arg4[%c0_3, %c0_4] : memref<8x1xf32, #tpu.memory_space<vmem>>, vector<8x1xf32>
    %cst_5 = arith.constant dense<0xFF800000> : vector<8xf32>
    %14 = vector.multi_reduction <maximumf>, %12, %cst_5 [1] : vector<8x128xf32> to vector<8xf32>
    %15 = vector.shape_cast %14 : vector<8xf32> to vector<8x1xf32>
    %16 = arith.maximumf %13, %15 : vector<8x1xf32>
    %17 = arith.subf %13, %16 : vector<8x1xf32>
    %18 = math.exp %17 : vector<8x1xf32>
    %c0_6 = arith.constant 0 : index
    %c0_7 = arith.constant 0 : index
    %19 = vector.load %arg5[%c0_6, %c0_7] : memref<8x1xf32, #tpu.memory_space<vmem>>, vector<8x1xf32>
    %20 = arith.mulf %18, %19 : vector<8x1xf32>
    %21 = vector.broadcast %16 : vector<8x1xf32> to vector<8x128xf32>
    %22 = arith.subf %12, %21 : vector<8x128xf32>
    %23 = math.exp %22 : vector<8x128xf32>
    %cst_8 = arith.constant dense<0.000000e+00> : vector<8xf32>
    %24 = vector.multi_reduction <add>, %23, %cst_8 [1] : vector<8x128xf32> to vector<8xf32>
    %25 = vector.shape_cast %24 : vector<8xf32> to vector<8x1xf32>
    %26 = arith.addf %20, %25 : vector<8x1xf32>
    %c0_9 = arith.constant 0 : index
    %c0_10 = arith.constant 0 : index
    %27 = vector.load %arg5[%c0_9, %c0_10] : memref<8x1xf32, #tpu.memory_space<vmem>>, vector<8x1xf32>
    tpu.vector_store %arg5[%c0_9, %c0_10], %26 {strides = array<i32>} : memref<8x1xf32, #tpu.memory_space<vmem>>, vector<8x1xf32>,
    %c0_11 = arith.constant 0 : index
    %c0_12 = arith.constant 0 : index
    %28 = vector.load %arg4[%c0_11, %c0_12] : memref<8x1xf32, #tpu.memory_space<vmem>>, vector<8x1xf32>
    tpu.vector_store %arg4[%c0_11, %c0_12], %16 {strides = array<i32>} : memref<8x1xf32, #tpu.memory_space<vmem>>, vector<8x1xf32>,
    %c2_i32 = arith.constant 2 : i32
    %29 = arith.cmpi eq, %arg1, %c2_i32 : i32
    %30 = arith.extui %29 : i1 to i32
    %c0_i32_13 = arith.constant 0 : i32
    %31 = arith.cmpi ne, %30, %c0_i32_13 : i32
    scf.if %31 {
      %c0_14 = arith.constant 0 : index
      %c0_15 = arith.constant 0 : index
      %32 = vector.load %arg4[%c0_14, %c0_15] : memref<8x1xf32, #tpu.memory_space<vmem>>, vector<8x1xf32>
      %c0_16 = arith.constant 0 : index
      %c0_17 = arith.constant 0 : index
      %33 = vector.load %arg5[%c0_16, %c0_17] : memref<8x1xf32, #tpu.memory_space<vmem>>, vector<8x1xf32>
      %34 = math.log %33 : vector<8x1xf32>
      %35 = arith.addf %32, %34 : vector<8x1xf32>
      %c0_18 = arith.constant 0 : index
      %c0_19 = arith.constant 0 : index
      %36 = vector.load %arg3[%c0_18, %c0_19] : memref<8x1xf32, #tpu.memory_space<vmem>>, vector<8x1xf32>
      tpu.vector_store %arg3[%c0_18, %c0_19], %35 {strides = array<i32>} : memref<8x1xf32, #tpu.memory_space<vmem>>, vector<8x1xf32>,
    } else {
    }
    return
  }
  func.func @transform_0(%arg0: i32, %arg1: i32) -> (i32, i32) {
    %c0_i32 = arith.constant 0 : i32
    return %arg0, %arg1 : i32, i32
  }
  func.func @transform_1(%arg0: i32, %arg1: i32) -> (i32, i32) {
    %c0_i32 = arith.constant 0 : i32
    %c0_i32_0 = arith.constant 0 : i32
    return %arg0, %c0_i32 : i32, i32
  }
}

</mosaic_0001>

<bundles_post_ra>
// kernel: tpu_custom_call.1
= control target key start
LH: loop header
LB: loop body
LE: loop exit
PB: predicated region body
PF: predicated region fallthrough
CT: control target
= control target key end

     0   :  { %6 = vsyncpa [#allocation5], 0  ;;  %s606_s0 = inlined_call_operand.hbm [shape: f32[20,300], index: 0, kind: input, shape index: {}]   ;;  %s607_s1 = inlined_call_operand.vmem [shape: f32[20,1], index: 1, kind: output, shape index: {}]  }
   0x1   :  { %8 = vsyncpa [#allocation5 + $0x1], 0  ;;  %s484_s6 = smov 0   ;;  %s486_s7 = smov 0  }
   0x2   :  { %s488_s8 = smov 0   ;;  %s490_s9 = smov 0  }
   0x3   :  { %s492_s10 = smov 0   ;;  %s494_s11 = smov 0  }
   0x4   :  { %s496_s12 = smov 0   ;;  %s498_s13 = smov 0  }
   0x5 LB: > { %s277_s14 = sadd.s32 4294967295, %s469_s13   ;;  %s23_s15 = sadd.s32 1, %s461_s11  ;;  %s469_s13 = sphi %s498_s13, %s14_s13   ;;  %s465_s12 = sphi %s496_s12, %s616_s12   ;;  %s461_s11 = sphi %s494_s11, %s615_s11   ;;  %s457_s10 = sphi %s492_s10, %s614_s10   ;;  %s453_s9 = sphi %s490_s9, %s613_s9   ;;  %s449_s8 = sphi %s488_s8, %s612_s8   ;;  %s445_s7 = sphi %s486_s7, %s611_s7   ;;  %s441_s6 = sphi %s484_s6, %s610_s6  }
   0x6   : > { %p24_p0 = scmp.ge.s32.totalorder %s23_s15, 3  ;;  %s26_s16 = sadd.s32 1, %s465_s12 }
   0x7   : > { %s35_s17 = sadd.s32 1, %s449_s8  ;;  %p42_p1 = scmp.ne.s32.totalorder %s449_s8, %s445_s7 }
   0x8   : > { %s618_s15 = smov (%p24_p0, %s23_s15), 0  ;;  %s620_s16 = smov (!%p24_p0, %s26_s16), %s465_s12 }
   0x9   : > { %s31_s18 = ssub.s32 %s461_s11, %s618_s15  ;;  %p43_p2 = scmp.eq.s32.totalorder %s469_s13, 0 }
   0xa   : > { %p28_p3 = scmp.ge.s32.totalorder %s620_s16, 3  ;;  %p48_p4 = scmp.ne.s32.totalorder %s445_s7, %s441_s6 }
   0xb   : > { %p535_p5 = por %p43_p2, %p42_p1  ;;  %p49_p6 = scmp.eq.s32.totalorder %s277_s14, 0 }
   0xc   : > { %s622_s16 = smov (%p28_p3, %s620_s16), 0  ;;  %p298_p8 = scmp.lt.s32.totalorder %s469_s13, 9 }
   0xd   : > { %p541_p7 = por %p49_p6, %p48_p4  ;;  %s30_s21 = ssub.s32 %s465_s12, %s622_s16 }
   0xe   : > { %s32_s22 = sor.u32 %s31_s18, %s30_s21  ;;  %s98_s23 = sand.u32 1, %s449_s8  }
   0xf   : > { %p33_p9 = scmp.eq.s32.totalorder %s32_s22, 0  ;;  %s281_s24 = sshll.u32 %s98_s23, 3 }
  0x10   : > { %s291_s25 = smul.u32 3, %s465_s12  ;;  %s102_s29 = scalar_lea.vmem [#allocation4], %s281_s24 }
  0x11   : > { %s551_s26 = scalar_select %p33_p9, %s449_s8, %s35_s17  }
  0x12   : > { %s106_s27 = sadd.s32 %s461_s11, %s291_s25  ;;  %s112_s30 = sshll.u32 %s102_s29, 4  ;;  %s113_s30 = int_to_ptr.vmem [resolvable:$true] %s112_s30 }
  0x13   : > { %s282_s28 = sshll.u32 %s106_s27, 3  ;;  %p295_p10 = pnand %p298_p8, %p535_p5 }
  0x14   : > { %s108_s4 = scalar_lea.hbm %s606_s0, %s282_s28  ;;  %p283_p11 = scmp.ge.s32.totalorder %s469_s13, 1 }
  0x15   : > { %s110_s5 = sshll.u32 %s108_s4, 4  ;;  %p117_p12 = scmp.lt.s32.totalorder %s469_s13, 10  ;;  %s111_s5 = int_to_ptr.hbm [resolvable:$true] %s110_s5 }
  0x16   : > { %s99_s6 = scalar_lea.sflag [#allocation5], %s98_s23 }
  0x17   : > { %297 = dma.hbm_to_vmem [thread:$0]  (!%p295_p10), %s111_s5, 128, %s113_s30, %s99_s6  }
  0x18   : > { %p118_p13 = pnand %p283_p11, %p117_p12 }
  0x19   : > { %s123_s14 = sand.u32 (!%p118_p13), 1, %s445_s7  }
  0x1a   : > { %121 = sbr.rel (%p118_p13) target bundleno = 430 (0x1ae), region = 24  ;;  %s284_s17 = sshll.u32 (!%p118_p13), %s123_s14, 3 }
  0x1b   : > { %s124_s18 = scalar_lea.sflag (!%p118_p13), [#allocation5], %s123_s14  ;;  %s127_s21 = scalar_lea.vmem (!%p118_p13), [#allocation4], %s284_s17 }
  0x1f   : > { %436 = dma.done.wait (%p541_p7), %s124_s18, 128  }
  0x20   : > { %438 = vsyncadd (%p541_p7), %s124_s18, 4294967168  ;;  %p146_p0 = scmp.lt.s32.totalorder %s457_s10, 2  ;;  %p286_p1 = scmp.ne.s32.totalorder %s453_s9, 0 }
  0x22   : > { %s624_s10 = smov (!%p146_p0, %s457_s10), 2  ;;  %153 = sbr.rel (%p286_p1) target bundleno = 42 (0x2a), region = 32 }
  0x23   : > { %s285_s19 = sshll.u32 %s624_s10, 3 }
  0x24   : > { %s573_s24 = scalar_lea.vmem %s607_s1, %s285_s19 }
  0x27   : > { %vm154_vm0 = vcmask 7168   ;;  %v471_v0 = vmov -inf   ;;  %v472_v1 = vmov 0.0  }
  0x28   : > { %155 = vst.msk [vmem:[#allocation2] sm:$0xff] %vm154_vm0, %v471_v0 }
  0x29   : > { %156 = vst.msk [vmem:[#allocation3] sm:$0xff] %vm154_vm0, %v472_v1 }
  0x2a PF: > { %v157_v2 = vld [vmem:[%s127_s21] sm:$0xff]  ;;  %s287_s20 = sshll.u32 %s453_s9, 7  ;;  %v161_v3 = vlaneseq  ;;  %v473_v8 = vmov 0   ;;  %vm186_vm2 = vcmask 7168   ;;  %p288_p2 = scmp.ne.s32.totalorder %s453_s9, 2 }
  0x2b   : > { %v158_v4 = vmul.f32 16.0, %v157_v2  ;;  %s160_s10 = ssub.s32 300, %s287_s20  ;;  %366 = vset.pattern.permute.xlu0 %v473_v8 }
  0x2c   : > { %v162_v5 = vand.u32 127, %v161_v3  ;;  %v163_v6 = vstv %s160_s10 }
  0x2e   : > { %vm164_vm1 = vcmp.lt.s32.totalorder %v162_v5, %v163_v6 }
  0x2f   : > { %v165_v7 = vsel %vm164_vm1, %v158_v4, -inf  ;;  %v166_v9 = vld [vmem:[#allocation2] sm:$0xff] }
  0x30   : > { %167 = vmax.xlane.f32.xlu0 %v165_v7  ;;  %v173_v19 = vld [vmem:[#allocation3] sm:$0xff] }
  0xa3   : > { %v168_v10 = vpop.xlane.xlu0 %167 }
  0xa4   : > { %v169_v11 = vmax.f32 %v166_v9, %v168_v10 }
  0xa6   : > { %v170_v12 = vsub.f32 %v166_v9, %v169_v11  ;;  %188 = vst.msk [vmem:[#allocation2] sm:$0xff] %vm186_vm2, %v169_v11  ;;  %177 = vperm.xlu0 %366, %v169_v11  }
  0xa8   : > { %v171_v17 = vmul.f32 1.442695, %v170_v12 }
 0x118   : > { %v178_v13 = vpop.permute.xlu0 %177 }
 0x119   : > { %v180_v14 = vsub.f32 %v165_v7, %v178_v13 }
 0x11b   : > { %v181_v15 = vmul.f32 1.442695, %v180_v14 }
 0x11d   : > { %367 = vpow2.f32 %v181_v15 }
 0x11e   : > { %369 = vpow2.f32 %v171_v17 }
 0x123   : > { %v368_v16 = vpop.eup %367 }
 0x124   : > { %183 = vadd.xlane.f32.xlu1 %v368_v16  ;;  %v370_v18 = vpop.eup %369 }
 0x125   : > { %v174_v20 = vmul.f32 %v370_v18, %v173_v19 }
 0x196   : > { %192 = sbr.rel (%p288_p2) target bundleno = 430 (0x1ae), region = 36 }
 0x197   : > { %v184_v21 = vpop.xlane.xlu1 %183 }
 0x198   : > { %v185_v22 = vadd.f32 %v184_v21, %v174_v20 }
 0x19a   : > { %187 = vst.msk [vmem:[#allocation3] sm:$0xff] %vm186_vm2, %v185_v22 }
 0x19b   : > { %v193_v25 = vld [vmem:[#allocation2] sm:$0xff] }
 0x1a1   : > { %v194_v23 = vld [vmem:[#allocation3] sm:$0xff] }
 0x1a2   : > { %371 = vlog2.f32 %v194_v23 }
 0x1a8   : > { %v372_v24 = vpop.eup %371 }
 0x1a9   : > { %v196_v26 = vmul.f32 0.6931472, %v372_v24 }
 0x1ab   : > { %v197_v27 = vadd.f32 %v196_v26, %v193_v25 }
 0x1ad   : > { %198 = vst.msk [vmem:[%s573_s24] sm:$0xff] %vm186_vm2, %v197_v27 }
 0x1ae PF: > { %s14_s13 = sadd.s32 1, %s469_s13   ;;  %s610_s6 = smov %s445_s7 }
 0x1af   : > { %p11_p3 = scmp.ge.s32.totalorder %s14_s13, 11   ;;  %s611_s7 = smov %s449_s8 }
 0x1b0   : > { %s612_s8 = smov %s551_s26  ;;  %s613_s9 = smov %s461_s11 }
 0x1b1   : > { %s614_s10 = smov %s465_s12  ;;  %s615_s11 = smov %s618_s15 }
 0x1b2   : > { %s616_s12 = smov %s622_s16  ;;  %13 = sbr.rel (!%p11_p3) target bundleno = 5 (0x5), region = 72 }
 0x1b7   :  { %218 = vsyncpa [#allocation5], 1 }
 0x1b8   :  { %220 = vsyncpa [#allocation5 + $0x1], 1 }

</bundles_post_ra>
